<compile_context>
chip_gen: v5e
topology: v5e:2x2
jax: 0.10.0
libtpu: 0.0.40
codegen_flags: <defaults>
</compile_context>

<pallas_src>
import math
import functools

import jax
import jax.numpy as jnp
from jax import lax
from jax.experimental import pallas as pl
from jax.experimental.pallas import tpu as pltpu


LN_EPS = 1e-5   # PyTorch nn.LayerNorm default
LANE = 128


def _round_up(v, m):
    return ((v + m - 1) // m) * m


def _device_info():
    """Best-effort (per-core VMEM bytes, multi-TensorCore?) query."""
    vmem_cap = 64 * 2**20            # conservative default (v7x per-TC)
    multi_tc = False
    try:
        vmem_cap = int(pltpu.get_tpu_info().vmem_capacity_bytes)
    except Exception:
        pass
    try:
        kind = jax.devices()[0].device_kind.lower()
        multi_tc = "v7" in kind       # 2 TCs/chip on v7x; v5e/v6e have 1
    except Exception:
        pass
    return vmem_cap, multi_tc


def _ffn_kernel(x_ref, w1_ref, b1_ref, w2_ref, b2_ref, o_ref,
                xn_ref, acc_ref, *, dim_true: int, approximate_gelu: bool):
    j = pl.program_id(1)

    @pl.when(j == 0)
    def _():
        # LayerNorm once per row tile; cache normalized rows for later chunks.
        x = x_ref[...].astype(jnp.float32)
        inv_n = 1.0 / float(dim_true)
        s = jnp.sum(x, axis=-1, keepdims=True)            # padded cols are 0
        ss = jnp.sum(x * x, axis=-1, keepdims=True)
        mean = s * inv_n
        var = jnp.maximum(ss * inv_n - mean * mean, 0.0)   # clamp E[x^2]-mean^2
        xn = (x - mean) * lax.rsqrt(var + LN_EPS)
        # gamma/beta are folded into W1/b1 on the host (see wrapper).
        xn_ref[...] = xn.astype(xn_ref.dtype)
        acc_ref[...] = jnp.zeros_like(acc_ref)

    # Linear(dim -> hidden chunk): matmul-dtype operands, f32 accumulation.
    h = jnp.dot(xn_ref[...], w1_ref[...],
                preferred_element_type=jnp.float32) + b1_ref[...].astype(jnp.float32)

    # GELU (f32; exact erf form matches torch.nn.GELU() default).
    if approximate_gelu:
        # tanh form: transcendental lands in the EUP slot (v6e/v7x perf path).
        c = math.sqrt(2.0 / math.pi)
        h = 0.5 * h * (1.0 + jnp.tanh(c * (h + 0.044715 * h * h * h)))
    else:
        h = 0.5 * h * (1.0 + lax.erf(h * (1.0 / math.sqrt(2.0))))

    # Dropout(p=0.0) is the identity.

    # Partial Linear(hidden chunk -> dim), accumulated across hidden chunks.
    acc_ref[...] += jnp.dot(h.astype(w2_ref.dtype), w2_ref[...],
                            preferred_element_type=jnp.float32)

    @pl.when(j == pl.num_programs(1) - 1)
    def _():
        o_ref[...] = (acc_ref[...] + b2_ref[...].astype(jnp.float32)).astype(o_ref.dtype)


@functools.partial(
    jax.jit,
    static_argnames=("tm", "matmul_dtype", "approximate_gelu", "max_hidden_tile"))
def feed_forward(x, gamma, beta, w1, b1, w2, b2, *,
                 tm=None, matmul_dtype=jnp.bfloat16, approximate_gelu=False,
                 max_hidden_tile=None):
    """x: (B, N, dim) -> (B, N, dim). w1: (dim, hidden), w2: (hidden, dim)."""
    B, N, dim = x.shape
    hidden = w1.shape[1]
    M = B * N

    dim_p = _round_up(dim, LANE)          # lane-dense stores
    hidden_p = _round_up(hidden, LANE)

    vmem_cap, multi_tc = _device_info()
    vmem_budget = int(vmem_cap * 0.85)    # leave Mosaic internal-scratch headroom

    xb = 4                                 # activations stay f32 at HBM boundary
    wb = jnp.dtype(matmul_dtype).itemsize

    # ---- token (row) tile: auto 512 on 128-MiB parts, 256 otherwise ----
    tm_req = tm if tm is not None else (512 if vmem_budget >= 96 * 2**20 else 256)
    tm_eff = min(_round_up(tm_req, 8), _round_up(M, 8))
    tiles_m = pl.cdiv(M, tm_eff)
    if multi_tc and tiles_m > 1 and tiles_m % 2 == 1:
        tiles_m += 1                       # balance parallel axis across 2 TCs (v7x)
    M_pad = tiles_m * tm_eff

    # ---- hidden tile: stream W1 cols / W2 rows when resident weights overflow ----
    def step_bytes(tk, n_buf_w):
        wbytes = n_buf_w * (dim_p * tk + tk * dim_p) * wb   # W1/W2 chunk buffers
        io = 2 * 2 * tm_eff * dim_p * xb                     # x + out tiles (2 bufs)
        scr = tm_eff * dim_p * (4 + wb)                      # f32 acc + cached xn
        hbuf = tm_eff * tk * (4 + wb)                        # h (f32) + low-prec copy
        vec = 2 * (tk + dim_p) * 4                           # b1 chunk, b2
        return wbytes + io + scr + hbuf + vec + (2 << 20)    # +2 MiB slack

    cap = hidden_p if max_hidden_tile is None else max(
        LANE, min(hidden_p, (max_hidden_tile // LANE) * LANE))
    tk_h = LANE
    for c in range(cap, LANE - 1, -LANE):
        if hidden_p % c != 0:
            continue
        n_buf = 1 if c == hidden_p else 2
        if step_bytes(c, n_buf) <= vmem_budget:
            tk_h = c
            break
    tiles_h = hidden_p // tk_h
    weights_resident = tiles_h == 1

    # ---- host-side prep: fold gamma into W1, beta into b1; pad to lane multiples ----
    w1f = gamma.astype(jnp.float32)[:, None] * w1.astype(jnp.float32)
    b1f = b1.astype(jnp.float32) + beta.astype(jnp.float32) @ w1.astype(jnp.float32)
    w1c = jnp.pad(w1f, ((0, dim_p - dim), (0, hidden_p - hidden))).astype(matmul_dtype)
    w2c = jnp.pad(w2.astype(jnp.float32),
                  ((0, hidden_p - hidden), (0, dim_p - dim))).astype(matmul_dtype)
    b1c = jnp.pad(b1f, (0, hidden_p - hidden)).reshape(1, hidden_p)
    b2c = jnp.pad(b2.astype(jnp.float32), (0, dim_p - dim)).reshape(1, dim_p)

    x2 = jnp.pad(x.reshape(M, dim), ((0, M_pad - M), (0, dim_p - dim)))

    # ---- BlockSpecs: single-buffer the grid-invariant operands ----
    def wspec(shape, index_map, always_const=False):
        if weights_resident or always_const:
            return pl.BlockSpec(shape, index_map, pipeline_mode=pl.Buffered(1))
        return pl.BlockSpec(shape, index_map)

    in_specs = [
        pl.BlockSpec((tm_eff, dim_p), lambda i, j: (i, 0)),          # x tile
        wspec((dim_p, tk_h), lambda i, j: (0, j)),                   # W1 chunk
        wspec((1, tk_h), lambda i, j: (0, j)),                       # b1 chunk
        wspec((tk_h, dim_p), lambda i, j: (j, 0)),                   # W2 chunk
        wspec((1, dim_p), lambda i, j: (0, 0), always_const=True),   # b2
    ]
    out_spec = pl.BlockSpec((tm_eff, dim_p), lambda i, j: (i, 0))

    est = step_bytes(tk_h, 1 if weights_resident else 2)
    vmem_limit = int(min(max(int(est * 1.3), 24 * 2**20), vmem_budget))

    kernel = functools.partial(_ffn_kernel, dim_true=dim,
                               approximate_gelu=approximate_gelu)

    out2 = pl.pallas_call(
        kernel,
        out_shape=jax.ShapeDtypeStruct((M_pad, dim_p), x.dtype),
        grid_spec=pltpu.PrefetchScalarGridSpec(
            num_scalar_prefetch=0,
            grid=(tiles_m, tiles_h),
            in_specs=in_specs,
            out_specs=out_spec,
            scratch_shapes=[
                pltpu.VMEM((tm_eff, dim_p), matmul_dtype),   # cached normalized rows
                pltpu.VMEM((tm_eff, dim_p), jnp.float32),    # f32 output accumulator
            ],
        ),
        compiler_params=pltpu.CompilerParams(
            dimension_semantics=("parallel", "arbitrary"),
            vmem_limit_bytes=vmem_limit,
        ),
    )(x2, w1c, b1c, w2c, b2c)

    return out2[:M, :dim].reshape(B, N, dim)


def _reference(x, gamma, beta, w1, b1, w2, b2):
    xf = x.astype(jnp.float32)
    mean = jnp.mean(xf, axis=-1, keepdims=True)
    var = jnp.mean((xf - mean) ** 2, axis=-1, keepdims=True)
    xn = (xf - mean) * lax.rsqrt(var + LN_EPS) * gamma + beta
    h = xn @ w1 + b1
    h = 0.5 * h * (1.0 + lax.erf(h / math.sqrt(2.0)))
    return (h @ w2 + b2).astype(x.dtype)


if __name__ == "__main__":
    # Small shapes consistent with the module: batch=2, seq=8, dim=32, hidden=64.
    B, N, dim, hidden = 2, 8, 32, 64

    key = jax.random.PRNGKey(0)
    kx, kg, kb, kw1, kb1, kw2, kb2 = jax.random.split(key, 7)

    x = jax.random.normal(kx, (B, N, dim), dtype=jnp.float32)

    # LayerNorm params (PyTorch default init: ones / zeros).
    gamma = jnp.ones((dim,), jnp.float32)
    beta = jnp.zeros((dim,), jnp.float32)

    # Linear params (deterministic random; stored as (in, out)).
    w1 = jax.random.normal(kw1, (dim, hidden), jnp.float32) * (1.0 / math.sqrt(dim))
    b1 = 0.01 * jax.random.normal(kb1, (hidden,), jnp.float32)
    w2 = jax.random.normal(kw2, (hidden, dim), jnp.float32) * (1.0 / math.sqrt(hidden))
    b2 = 0.01 * jax.random.normal(kb2, (dim,), jnp.float32)

    ref = _reference(x, gamma, beta, w1, b1, w2, b2)

    # (A) f32 matmul path, resident weights: tight check against the reference.
    out_f32 = jax.block_until_ready(
        feed_forward(x, gamma, beta, w1, b1, w2, b2, matmul_dtype=jnp.float32))
    assert out_f32.shape == (B, N, dim)
    assert jnp.allclose(out_f32, ref, atol=5e-4, rtol=5e-4)

    # (B) default perf path (bf16 operands, f32 accumulation) with non-trivial
    #     gamma/beta to exercise the host-side gamma/beta folding.
    gamma_b = 1.0 + 0.1 * jax.random.normal(kg, (dim,), jnp.float32)
    beta_b = 0.1 * jax.random.normal(kb, (dim,), jnp.float32)
    ref_b = _reference(x, gamma_b, beta_b, w1, b1, w2, b2)
    out_bf16 = jax.block_until_ready(
        feed_forward(x, gamma_b, beta_b, w1, b1, w2, b2))
    assert out_bf16.shape == (B, N, dim)
    assert jnp.allclose(out_bf16, ref_b, atol=5e-2, rtol=5e-2)

    # (C) streamed-hidden path (force 128-wide hidden chunks on hidden=256) to
    #     exercise the accumulator / pl.when init-finalize logic.
    hidden2 = 256
    kw1b, kb1b, kw2b, kb2b = jax.random.split(jax.random.PRNGKey(1), 4)
    w1b = jax.random.normal(kw1b, (dim, hidden2), jnp.float32) * (1.0 / math.sqrt(dim))
    b1b = 0.01 * jax.random.normal(kb1b, (hidden2,), jnp.float32)
    w2b = jax.random.normal(kw2b, (hidden2, dim), jnp.float32) * (1.0 / math.sqrt(hidden2))
    b2b = 0.01 * jax.random.normal(kb2b, (dim,), jnp.float32)
    ref2 = _reference(x, gamma, beta, w1b, b1b, w2b, b2b)
    out_stream = jax.block_until_ready(
        feed_forward(x, gamma, beta, w1b, b1b, w2b, b2b,
                     matmul_dtype=jnp.float32, max_hidden_tile=128))
    assert out_stream.shape == (B, N, dim)
    assert jnp.allclose(out_stream, ref2, atol=1e-3, rtol=1e-3)

    print("KERNEL_OK")
</pallas_src>

<mosaic_0001>
module attributes {stable_mosaic.version = 11 : i64} {
  func.func @_ffn_kernel(%arg0: i32, %arg1: i32, %arg2: memref<16x128xf32, #tpu.memory_space<vmem>>, %arg3: memref<128x128xf32, #tpu.memory_space<vmem>>, %arg4: memref<1x128xf32, #tpu.memory_space<vmem>>, %arg5: memref<128x128xf32, #tpu.memory_space<vmem>>, %arg6: memref<1x128xf32, #tpu.memory_space<vmem>>, %arg7: memref<16x128xf32, #tpu.memory_space<vmem>>, %arg8: memref<16x128xf32, #tpu.memory_space<vmem>>, %arg9: memref<16x128xf32, #tpu.memory_space<vmem>>) attributes {dimension_semantics = [#tpu.dimension_semantics<parallel>, #tpu.dimension_semantics<arbitrary>], iteration_bounds = array<i64: 1, 1>, scalar_prefetch = 0 : i64, scratch_operands = 2 : i64, tpu.core_type = #tpu.core_type<tc>, window_params = [{transform_indices = @transform_0, window_bounds = array<i64: 16, 128>}, {pipeline_mode = #tpu.pipeline_mode<synchronous>, transform_indices = @transform_1, window_bounds = array<i64: 128, 128>}, {pipeline_mode = #tpu.pipeline_mode<synchronous>, transform_indices = @transform_2, window_bounds = array<i64: 1, 128>}, {pipeline_mode = #tpu.pipeline_mode<synchronous>, transform_indices = @transform_3, window_bounds = array<i64: 128, 128>}, {pipeline_mode = #tpu.pipeline_mode<synchronous>, transform_indices = @transform_4, window_bounds = array<i64: 1, 128>}, {transform_indices = @transform_5, window_bounds = array<i64: 16, 128>}]} {
    %c0_i32 = arith.constant 0 : i32
    %0 = arith.cmpi eq, %arg1, %c0_i32 : i32
    %1 = arith.extui %0 : i1 to i32
    %c0_i32_0 = arith.constant 0 : i32
    %2 = arith.cmpi ne, %1, %c0_i32_0 : i32
    scf.if %2 {
      %c0_18 = arith.constant 0 : index
      %c0_19 = arith.constant 0 : index
      %25 = vector.load %arg2[%c0_18, %c0_19] : memref<16x128xf32, #tpu.memory_space<vmem>>, vector<16x128xf32>
      %cst_20 = arith.constant dense<0.000000e+00> : vector<16xf32>
      %26 = vector.multi_reduction <add>, %25, %cst_20 [1] : vector<16x128xf32> to vector<16xf32>
      %27 = vector.shape_cast %26 : vector<16xf32> to vector<16x1xf32>
      %28 = arith.mulf %25, %25 : vector<16x128xf32>
      %cst_21 = arith.constant dense<0.000000e+00> : vector<16xf32>
      %29 = vector.multi_reduction <add>, %28, %cst_21 [1] : vector<16x128xf32> to vector<16xf32>
      %30 = vector.shape_cast %29 : vector<16xf32> to vector<16x1xf32>
      %cst_22 = arith.constant 3.125000e-02 : f32
      %31 = vector.broadcast %cst_22 : f32 to vector<16x1xf32>
      %32 = arith.mulf %27, %31 : vector<16x1xf32>
      %cst_23 = arith.constant 3.125000e-02 : f32
      %33 = vector.broadcast %cst_23 : f32 to vector<16x1xf32>
      %34 = arith.mulf %30, %33 : vector<16x1xf32>
      %35 = arith.mulf %32, %32 : vector<16x1xf32>
      %36 = arith.subf %34, %35 : vector<16x1xf32>
      %cst_24 = arith.constant 0.000000e+00 : f32
      %37 = vector.broadcast %cst_24 : f32 to vector<16x1xf32>
      %38 = arith.maximumf %36, %37 : vector<16x1xf32>
      %39 = vector.broadcast %32 : vector<16x1xf32> to vector<16x128xf32>
      %40 = arith.subf %25, %39 : vector<16x128xf32>
      %cst_25 = arith.constant 9.99999974E-6 : f32
      %41 = vector.broadcast %cst_25 : f32 to vector<16x1xf32>
      %42 = arith.addf %38, %41 : vector<16x1xf32>
      %43 = math.rsqrt %42 : vector<16x1xf32>
      %44 = vector.broadcast %43 : vector<16x1xf32> to vector<16x128xf32>
      %45 = arith.mulf %40, %44 : vector<16x128xf32>
      %c0_26 = arith.constant 0 : index
      %c0_27 = arith.constant 0 : index
      %46 = vector.load %arg8[%c0_26, %c0_27] : memref<16x128xf32, #tpu.memory_space<vmem>>, vector<16x128xf32>
      tpu.vector_store %arg8[%c0_26, %c0_27], %45 {strides = array<i32>} : memref<16x128xf32, #tpu.memory_space<vmem>>, vector<16x128xf32>,
      %cst_28 = arith.constant 0.000000e+00 : f32
      %47 = vector.broadcast %cst_28 : f32 to vector<16x128xf32>
      %c0_29 = arith.constant 0 : index
      %c0_30 = arith.constant 0 : index
      %48 = vector.load %arg9[%c0_29, %c0_30] : memref<16x128xf32, #tpu.memory_space<vmem>>, vector<16x128xf32>
      tpu.vector_store %arg9[%c0_29, %c0_30], %47 {strides = array<i32>} : memref<16x128xf32, #tpu.memory_space<vmem>>, vector<16x128xf32>,
    } else {
    }
    %c0 = arith.constant 0 : index
    %c0_1 = arith.constant 0 : index
    %3 = vector.load %arg8[%c0, %c0_1] : memref<16x128xf32, #tpu.memory_space<vmem>>, vector<16x128xf32>
    %c0_2 = arith.constant 0 : index
    %c0_3 = arith.constant 0 : index
    %4 = vector.load %arg3[%c0_2, %c0_3] : memref<128x128xf32, #tpu.memory_space<vmem>>, vector<128x128xf32>
    %cst = arith.constant dense<0.000000e+00> : vector<16x128xf32>
    %5 = tpu.matmul %3, %4, %cst {dimension_numbers = #tpu.dot_dimension_numbers<[1], [0], [0], [1], [0, 0, 1, 1], [], []>} : vector<16x128xf32>, vector<128x128xf32>, vector<16x128xf32> -> vector<16x128xf32>
    %c0_4 = arith.constant 0 : index
    %c0_5 = arith.constant 0 : index
    %6 = vector.load %arg4[%c0_4, %c0_5] : memref<1x128xf32, #tpu.memory_space<vmem>>, vector<1x128xf32>
    %7 = vector.broadcast %6 : vector<1x128xf32> to vector<16x128xf32>
    %8 = arith.addf %5, %7 : vector<16x128xf32>
    %cst_6 = arith.constant 5.000000e-01 : f32
    %9 = vector.broadcast %cst_6 : f32 to vector<16x128xf32>
    %10 = arith.mulf %9, %8 : vector<16x128xf32>
    %cst_7 = arith.constant 0.707106769 : f32
    %11 = vector.broadcast %cst_7 : f32 to vector<16x128xf32>
    %12 = arith.mulf %8, %11 : vector<16x128xf32>
    %13 = math.erf %12 : vector<16x128xf32>
    %cst_8 = arith.constant 1.000000e+00 : f32
    %14 = vector.broadcast %cst_8 : f32 to vector<16x128xf32>
    %15 = arith.addf %14, %13 : vector<16x128xf32>
    %16 = arith.mulf %10, %15 : vector<16x128xf32>
    %c0_9 = arith.constant 0 : index
    %c0_10 = arith.constant 0 : index
    %17 = vector.load %arg9[%c0_9, %c0_10] : memref<16x128xf32, #tpu.memory_space<vmem>>, vector<16x128xf32>
    %c0_11 = arith.constant 0 : index
    %c0_12 = arith.constant 0 : index
    %18 = vector.load %arg5[%c0_11, %c0_12] : memref<128x128xf32, #tpu.memory_space<vmem>>, vector<128x128xf32>
    %cst_13 = arith.constant dense<0.000000e+00> : vector<16x128xf32>
    %19 = tpu.matmul %16, %18, %cst_13 {dimension_numbers = #tpu.dot_dimension_numbers<[1], [0], [0], [1], [0, 0, 1, 1], [], []>} : vector<16x128xf32>, vector<128x128xf32>, vector<16x128xf32> -> vector<16x128xf32>
    %20 = arith.addf %17, %19 : vector<16x128xf32>
    %c0_14 = arith.constant 0 : index
    %c0_15 = arith.constant 0 : index
    %21 = vector.load %arg9[%c0_14, %c0_15] : memref<16x128xf32, #tpu.memory_space<vmem>>, vector<16x128xf32>
    tpu.vector_store %arg9[%c0_14, %c0_15], %20 {strides = array<i32>} : memref<16x128xf32, #tpu.memory_space<vmem>>, vector<16x128xf32>,
    %c0_i32_16 = arith.constant 0 : i32
    %22 = arith.cmpi eq, %arg1, %c0_i32_16 : i32
    %23 = arith.extui %22 : i1 to i32
    %c0_i32_17 = arith.constant 0 : i32
    %24 = arith.cmpi ne, %23, %c0_i32_17 : i32
    scf.if %24 {
      %c0_18 = arith.constant 0 : index
      %c0_19 = arith.constant 0 : index
      %25 = vector.load %arg9[%c0_18, %c0_19] : memref<16x128xf32, #tpu.memory_space<vmem>>, vector<16x128xf32>
      %c0_20 = arith.constant 0 : index
      %c0_21 = arith.constant 0 : index
      %26 = vector.load %arg6[%c0_20, %c0_21] : memref<1x128xf32, #tpu.memory_space<vmem>>, vector<1x128xf32>
      %27 = vector.broadcast %26 : vector<1x128xf32> to vector<16x128xf32>
      %28 = arith.addf %25, %27 : vector<16x128xf32>
      %c0_22 = arith.constant 0 : index
      %c0_23 = arith.constant 0 : index
      %29 = vector.load %arg7[%c0_22, %c0_23] : memref<16x128xf32, #tpu.memory_space<vmem>>, vector<16x128xf32>
      tpu.vector_store %arg7[%c0_22, %c0_23], %28 {strides = array<i32>} : memref<16x128xf32, #tpu.memory_space<vmem>>, vector<16x128xf32>,
    } else {
    }
    return
  }
  func.func @transform_0(%arg0: i32, %arg1: i32) -> (i32, i32) {
    %c0_i32 = arith.constant 0 : i32
    %c0_i32_0 = arith.constant 0 : i32
    return %arg0, %c0_i32 : i32, i32
  }
  func.func @transform_1(%arg0: i32, %arg1: i32) -> (i32, i32) {
    %c0_i32 = arith.constant 0 : i32
    %c0_i32_0 = arith.constant 0 : i32
    return %c0_i32, %arg1 : i32, i32
  }
  func.func @transform_2(%arg0: i32, %arg1: i32) -> (i32, i32) {
    %c0_i32 = arith.constant 0 : i32
    %c0_i32_0 = arith.constant 0 : i32
    return %c0_i32, %arg1 : i32, i32
  }
  func.func @transform_3(%arg0: i32, %arg1: i32) -> (i32, i32) {
    %c0_i32 = arith.constant 0 : i32
    %c0_i32_0 = arith.constant 0 : i32
    return %arg1, %c0_i32 : i32, i32
  }
  func.func @transform_4(%arg0: i32, %arg1: i32) -> (i32, i32) {
    %c0_i32 = arith.constant 0 : i32
    %c0_i32_0 = arith.constant 0 : i32
    %c0_i32_1 = arith.constant 0 : i32
    return %c0_i32, %c0_i32_0 : i32, i32
  }
  func.func @transform_5(%arg0: i32, %arg1: i32) -> (i32, i32) {
    %c0_i32 = arith.constant 0 : i32
    %c0_i32_0 = arith.constant 0 : i32
    return %arg0, %c0_i32 : i32, i32
  }
}

</mosaic_0001>

<bundles_post_ra>
// kernel: feed_forward.1
= control target key start
LH: loop header
LB: loop body
LE: loop exit
PB: predicated region body
PF: predicated region fallthrough
CT: control target
= control target key end

     0   :  { %s501_s0 = inlined_call_operand.vmem [shape: f32[16,128], index: 0, kind: input, shape index: {}]   ;;  %s502_s2 = inlined_call_operand.vmem [shape: f32[1,128], index: 2, kind: input, shape index: {}]   ;;  %s503_s1 = inlined_call_operand.vmem [shape: f32[128,128], index: 1, kind: input, shape index: {}]   ;;  %s504_s4 = inlined_call_operand.vmem [shape: f32[1,128], index: 4, kind: input, shape index: {}]   ;;  %s505_s3 = inlined_call_operand.vmem [shape: f32[128,128], index: 3, kind: input, shape index: {}]   ;;  %s506_s5 = inlined_call_operand.vmem [shape: f32[16,128], index: 5, kind: output, shape index: {}]  }
   0x1   :  { %v348_v0 = vld [vmem:[%s501_s0 + $0x8] sm:$0xff]  ;;  %v353_v1 = vld [vmem:[%s501_s0] sm:$0xff]  ;;  %v93_v4 = vld [vmem:[%s503_s1 + $0x78] sm:$0xff] }
   0x2   :  { %28 = vadd.xlane.f32.xlu0 %v348_v0  ;;  %26 = vadd.xlane.f32.xlu1 %v353_v1  ;;  %v31_v2 = vmul.f32 %v348_v0, %v348_v0  ;;  %v30_v3 = vmul.f32 %v353_v1, %v353_v1  ;;  %v92_v5 = vld [vmem:[%s503_s1 + $0x70] sm:$0xff]  ;;  %v91_v6 = vld [vmem:[%s503_s1 + $0x68] sm:$0xff]  ;;  %v90_v7 = vld [vmem:[%s503_s1 + $0x60] sm:$0xff] }
   0x3   :  { %98 = vmatpush.msra.mxu0 %v93_v4  ;;  %273 = vmatpush.msra.mxu2 %v93_v4  ;;  %v89_v8 = vld [vmem:[%s503_s1 + $0x58] sm:$0xff]  ;;  %v88_v9 = vld [vmem:[%s503_s1 + $0x50] sm:$0xff]  ;;  %v87_v10 = vld [vmem:[%s503_s1 + $0x48] sm:$0xff] }
   0x4   :  { %v86_v11 = vld [vmem:[%s503_s1 + $0x40] sm:$0xff]  ;;  %v85_v12 = vld [vmem:[%s503_s1 + $0x38] sm:$0xff]  ;;  %v84_v13 = vld [vmem:[%s503_s1 + $0x30] sm:$0xff] }
   0x5   :  { %99 = vmatpush.msra.mxu0 %v92_v5  ;;  %274 = vmatpush.msra.mxu2 %v92_v5  ;;  %v83_v14 = vld [vmem:[%s503_s1 + $0x28] sm:$0xff]  ;;  %v82_v15 = vld [vmem:[%s503_s1 + $0x20] sm:$0xff]  ;;  %v81_v16 = vld [vmem:[%s503_s1 + $0x18] sm:$0xff] }
   0x6   :  { %v80_v17 = vld [vmem:[%s503_s1 + $0x10] sm:$0xff]  ;;  %v79_v20 = vld [vmem:[%s503_s1 + $0x8] sm:$0xff]  ;;  %v78_v21 = vld [vmem:[%s503_s1] sm:$0xff] }
   0x7   :  { %100 = vmatpush.msra.mxu0 %v91_v6  ;;  %275 = vmatpush.msra.mxu2 %v91_v6  ;;  %v226_v54 = vld [vmem:[%s505_s3 + $0x78] sm:$0xff]  ;;  %v225_v55 = vld [vmem:[%s505_s3 + $0x70] sm:$0xff]  ;;  %v224_v56 = vld [vmem:[%s505_s3 + $0x68] sm:$0xff] }
   0x8   :  { %227 = vmatpush.msra.mxu1 %v226_v54  ;;  %289 = vmatpush.msra.mxu3 %v226_v54  ;;  %v223_v57 = vld [vmem:[%s505_s3 + $0x60] sm:$0xff]  ;;  %v222_v59 = vld [vmem:[%s505_s3 + $0x58] sm:$0xff]  ;;  %v221_v61 = vld [vmem:[%s505_s3 + $0x50] sm:$0xff] }
   0x9   :  { %101 = vmatpush.msra.mxu0 %v90_v7  ;;  %276 = vmatpush.msra.mxu2 %v90_v7  ;;  %v305_v58 = vld [vmem:[%s502_s2] ss:$0 sm:$0xff]  ;;  %v220_v63 = vld [vmem:[%s505_s3 + $0x48] sm:$0xff]  ;;  %v217_v6 = vld [vmem:[%s505_s3 + $0x30] sm:$0xff] }
   0xa   :  { %34 = vadd.xlane.f32.xlu0 %v31_v2  ;;  %32 = vadd.xlane.f32.xlu1 %v30_v3  ;;  %v218_v2 = vld [vmem:[%s505_s3 + $0x38] sm:$0xff] }
   0xb   :  { %102 = vmatpush.msra.mxu0 %v89_v8  ;;  %277 = vmatpush.msra.mxu2 %v89_v8 }
   0xc   :  { %228 = vmatpush.msra.mxu1 %v225_v55  ;;  %290 = vmatpush.msra.mxu3 %v225_v55 }
   0xd   :  { %103 = vmatpush.msra.mxu0 %v88_v9  ;;  %278 = vmatpush.msra.mxu2 %v88_v9  ;;  %v216_v9 = vld [vmem:[%s505_s3 + $0x28] sm:$0xff] }
   0xe   :  { %229 = vmatpush.msra.mxu1 %v224_v56  ;;  %291 = vmatpush.msra.mxu3 %v224_v56 }
   0xf   :  { %104 = vmatpush.msra.mxu0 %v87_v10  ;;  %279 = vmatpush.msra.mxu2 %v87_v10 }
  0x10   :  { %230 = vmatpush.msra.mxu1 %v223_v57  ;;  %292 = vmatpush.msra.mxu3 %v223_v57 }
  0x11   :  { %105 = vmatpush.msra.mxu0 %v86_v11  ;;  %280 = vmatpush.msra.mxu2 %v86_v11 }
  0x12   :  { %231 = vmatpush.msra.mxu1 %v222_v59  ;;  %293 = vmatpush.msra.mxu3 %v222_v59 }
  0x13   :  { %106 = vmatpush.msra.mxu0 %v85_v12  ;;  %281 = vmatpush.msra.mxu2 %v85_v12 }
  0x14   :  { %232 = vmatpush.msra.mxu1 %v221_v61  ;;  %294 = vmatpush.msra.mxu3 %v221_v61 }
  0x15   :  { %107 = vmatpush.msra.mxu0 %v84_v13  ;;  %282 = vmatpush.msra.mxu2 %v84_v13  ;;  %v215_v13 = vld [vmem:[%s505_s3 + $0x20] sm:$0xff] }
  0x16   :  { %233 = vmatpush.msra.mxu1 %v220_v63  ;;  %295 = vmatpush.msra.mxu3 %v220_v63 }
  0x17   :  { %108 = vmatpush.msra.mxu0 %v83_v14  ;;  %283 = vmatpush.msra.mxu2 %v83_v14 }
  0x19   :  { %109 = vmatpush.msra.mxu0 %v82_v15  ;;  %284 = vmatpush.msra.mxu2 %v82_v15 }
  0x1b   :  { %110 = vmatpush.msra.mxu0 %v81_v16  ;;  %285 = vmatpush.msra.mxu2 %v81_v16 }
  0x1d   :  { %111 = vmatpush.msra.mxu0 %v80_v17  ;;  %286 = vmatpush.msra.mxu2 %v80_v17  ;;  %v214_v17 = vld [vmem:[%s505_s3 + $0x18] sm:$0xff] }
  0x1f   :  { %112 = vmatpush.msra.mxu0 %v79_v20  ;;  %287 = vmatpush.msra.mxu2 %v79_v20 }
  0x21   :  { %113 = vmatpush.msra.mxu0 %v78_v21  ;;  %288 = vmatpush.msra.mxu2 %v78_v21  ;;  %v213_v21 = vld [vmem:[%s505_s3 + $0x10] sm:$0xff] }
  0x75   :  { %v29_v18 = vpop.xlane.xlu0 %28  ;;  %v27_v19 = vpop.xlane.xlu1 %26 }
  0x76   :  { %v36_v22 = vmul.f32 0.03125, %v27_v19  ;;  %v37_v23 = vmul.f32 0.03125, %v29_v18 }
  0x78   :  { %v40_v24 = vmul.f32 %v36_v22, %v36_v22  ;;  %v41_v27 = vmul.f32 %v37_v23, %v37_v23  ;;  %v47_v47 = vsub.f32 %v348_v0, %v37_v23  ;;  %v46_v49 = vsub.f32 %v353_v1, %v36_v22  ;;  %v219_v0 = vld [vmem:[%s505_s3 + $0x40] sm:$0xff] }
  0x79   :  { %234 = vmatpush.msra.mxu1 %v219_v0  ;;  %296 = vmatpush.msra.mxu3 %v219_v0 }
  0x7b   :  { %235 = vmatpush.msra.mxu1 %v218_v2  ;;  %297 = vmatpush.msra.mxu3 %v218_v2 }
  0x7d   :  { %v35_v25 = vpop.xlane.xlu0 %34  ;;  %v33_v26 = vpop.xlane.xlu1 %32  ;;  %236 = vmatpush.msra.mxu1 %v217_v6  ;;  %298 = vmatpush.msra.mxu3 %v217_v6 }
  0x7e   :  { %v39_v28 = vmul.f32 0.03125, %v35_v25  ;;  %v38_v29 = vmul.f32 0.03125, %v33_v26  ;;  %v212_v26 = vld [vmem:[%s505_s3 + $0x8] sm:$0xff] }
  0x7f   :  { %237 = vmatpush.msra.mxu1 %v216_v9  ;;  %299 = vmatpush.msra.mxu3 %v216_v9 }
  0x80   :  { %v43_v30 = vsub.f32 %v39_v28, %v41_v27  ;;  %v42_v31 = vsub.f32 %v38_v29, %v40_v24 }
  0x81   :  { %238 = vmatpush.msra.mxu1 %v215_v13  ;;  %300 = vmatpush.msra.mxu3 %v215_v13 }
  0x82   :  { %v45_v32 = vmax.f32 %v43_v30, 0.0  ;;  %v44_v33 = vmax.f32 %v42_v31, 0.0  ;;  %v211_v30 = vld [vmem:[%s505_s3] sm:$0xff] }
  0x83   :  { %239 = vmatpush.msra.mxu1 %v214_v17  ;;  %301 = vmatpush.msra.mxu3 %v214_v17 }
  0x84   :  { %v49_v34 = vadd.f32 1e-05, %v45_v32  ;;  %v48_v35 = vadd.f32 1e-05, %v44_v33 }
  0x85   :  { %240 = vmatpush.msra.mxu1 %v213_v21  ;;  %302 = vmatpush.msra.mxu3 %v213_v21 }
  0x86   :  { %307 = vrsqrt.f32 %v49_v34  ;;  %vm56_vm1 = vweird.f32 %v48_v35  ;;  %vm66_vm3 = vweird.f32 %v49_v34 }
  0x87   :  { %309 = vrsqrt.f32 %v48_v35  ;;  %241 = vmatpush.msra.mxu1 %v212_v26  ;;  %303 = vmatpush.msra.mxu3 %v212_v26 }
  0x89   :  { %242 = vmatpush.msra.mxu1 %v211_v30  ;;  %304 = vmatpush.msra.mxu3 %v211_v30 }
  0x8c   :  { %v308_v36 = vpop.eup %307 }
  0x8d   :  { %v310_v37 = vpop.eup %309  ;;  %v61_v38 = vmul.f32 %v308_v36, %v49_v34  ;;  %vm67_vm0 = vweird.f32 %v308_v36 }
  0x8e   :  { %v51_v39 = vmul.f32 %v310_v37, %v48_v35  ;;  %vm57_vm2 = vweird.f32 %v310_v37  ;;  %vm68_vm4 = vmor %vm66_vm3, %vm67_vm0 }
  0x8f   :  { %v62_v40 = vmul.f32 %v308_v36, %v61_v38  ;;  %vm58_vm5 = vmor %vm56_vm1, %vm57_vm2 }
  0x90   :  { %v52_v41 = vmul.f32 %v310_v37, %v51_v39 }
  0x91   :  { %v63_v42 = vmul.f32 0.5, %v62_v40 }
  0x92   :  { %v53_v43 = vmul.f32 0.5, %v52_v41 }
  0x93   :  { %v64_v44 = vsub.f32 1.5, %v63_v42 }
  0x94   :  { %v54_v45 = vsub.f32 1.5, %v53_v43 }
  0x95   :  { %v65_v46 = vmul.f32 %v308_v36, %v64_v44 }
  0x96   :  { %v55_v48 = vmul.f32 %v310_v37, %v54_v45 }
  0x97   :  { %v69_v50 = vsel %vm68_vm4, %v308_v36, %v65_v46 }
  0x98   :  { %v59_v51 = vsel %vm58_vm5, %v310_v37, %v55_v48  ;;  %v71_v52 = vmul.f32 %v69_v50, %v47_v47 }
  0x99   :  { %v70_v53 = vmul.f32 %v59_v51, %v46_v49 }
  0x9a   :  { %117 = vmatmul.f32.vlgmr.msra.gmra.mxu2 %v71_v52 }
  0x9b   :  { %114 = vmatmul.f32.vlgmr.msra.gmra.mxu0 %v70_v53 }
 0x118   :  { %v115_v60 = vpop.f32.mrf.mxu0 }
 0x119   :  { %v432_v62 = vadd.f32 %v305_v58, %v115_v60 }
 0x11b   :  { %v441_v1 = vmul.f32 0.70710677, %v432_v62 }
 0x11d   :  { %v125_v3 = vmul.f32 %v441_v1, %v441_v1  ;;  %v118_v4 = vpop.f32.mrf.mxu2 }
 0x11e   :  { %v448_v5 = vadd.f32 %v305_v58, %v118_v4 }
 0x11f   :  { %v453_v7 = vmin.f32 %v125_v3, 16.0 }
 0x120   :  { %v456_v8 = vmul.f32 0.70710677, %v448_v5 }
 0x121   :  { %v127_v10 = vmul.f32 2.1237322e-06, %v453_v7  ;;  %v138_v11 = vmul.f32 3.8918573e-05, %v453_v7 }
 0x122   :  { %v165_v12 = vmul.f32 %v456_v8, %v456_v8 }
 0x123   :  { %v128_v14 = vadd.f32 0.00028619796, %v127_v10  ;;  %v139_v15 = vadd.f32 0.001143296, %v138_v11 }
 0x124   :  { %v166_v16 = vmin.f32 %v165_v12, 16.0 }
 0x125   :  { %v129_v18 = vmul.f32 %v128_v14, %v453_v7  ;;  %v140_v19 = vmul.f32 %v139_v15, %v453_v7 }
 0x126   :  { %v167_v20 = vmul.f32 2.1237322e-06, %v166_v16  ;;  %v178_v22 = vmul.f32 3.8918573e-05, %v166_v16 }
 0x127   :  { %v130_v23 = vadd.f32 0.0036580483, %v129_v18  ;;  %v141_v24 = vadd.f32 0.014752088, %v140_v19  ;;  %v121_v19 = vmul.f32 0.5, %v432_v62 }
 0x128   :  { %v168_v25 = vadd.f32 0.00028619796, %v167_v20  ;;  %v179_v27 = vadd.f32 0.001143296, %v178_v22 }
 0x129   :  { %v142_v28 = vmul.f32 %v141_v24, %v453_v7  ;;  %v131_v32 = vmul.f32 %v130_v23, %v453_v7 }
 0x12a   :  { %v169_v29 = vmul.f32 %v168_v25, %v166_v16  ;;  %v180_v31 = vmul.f32 %v179_v27, %v166_v16  ;;  %v122_v25 = vmul.f32 0.5, %v448_v5 }
 0x12b   :  { %v143_v33 = vadd.f32 0.112945676, %v142_v28  ;;  %v132_v38 = vadd.f32 0.05243302, %v131_v32  ;;  %v306_v28 = vld [vmem:[%s504_s4] ss:$0 sm:$0xff] }
 0x12c   :  { %v170_v34 = vadd.f32 0.0036580483, %v169_v29  ;;  %v181_v35 = vadd.f32 0.014752088, %v180_v31 }
 0x12d   :  { %v144_v36 = vmul.f32 %v143_v33, %v453_v7  ;;  %v133_v44 = vmul.f32 %v132_v38, %v453_v7 }
 0x12e   :  { %v182_v37 = vmul.f32 %v181_v35, %v166_v16  ;;  %v171_v40 = vmul.f32 %v170_v34, %v166_v16 }
 0x12f   :  { %v145_v39 = vadd.f32 0.4994258, %v144_v36  ;;  %v134_v49 = vadd.f32 0.18741608, %v133_v44 }
 0x130   :  { %v183_v41 = vadd.f32 0.112945676, %v182_v37  ;;  %v172_v46 = vadd.f32 0.05243302, %v171_v40 }
 0x131   :  { %v146_v42 = vmul.f32 %v145_v39, %v453_v7  ;;  %v135_v53 = vmul.f32 %v134_v49, %v453_v7 }
 0x132   :  { %v184_v43 = vmul.f32 %v183_v41, %v166_v16  ;;  %v173_v50 = vmul.f32 %v172_v46, %v166_v16 }
 0x133   :  { %v147_v45 = vadd.f32 1.0, %v146_v42  ;;  %v136_v57 = vadd.f32 1.1283791, %v135_v53 }
 0x134   :  { %v185_v47 = vadd.f32 0.4994258, %v184_v43  ;;  %v174_v54 = vadd.f32 0.18741608, %v173_v50 }
 0x135   :  { %311 = vrcp.f32 %v147_v45  ;;  %v159_v58 = vand.u32 2147483648, %v147_v45  ;;  %v157_v63 = vand.u32 2147483647, %v147_v45  ;;  %vm153_vm7 = vweird.f32 %v147_v45 }
 0x136   :  { %v186_v48 = vmul.f32 %v185_v47, %v166_v16  ;;  %v175_v60 = vmul.f32 %v174_v54, %v166_v16  ;;  %v137_v3 = vmul.f32 %v136_v57, %v441_v1 }
 0x137   :  { %v160_v4 = vor.u32 1.1754944e-38, %v159_v58  ;;  %vm158_vm9 = vcmp.eq.f32.partialorder %v157_v63, 8.507059e+37 }
 0x138   :  { %v187_v51 = vadd.f32 1.0, %v186_v48  ;;  %v176_v9 = vadd.f32 1.1283791, %v175_v60 }
 0x13a   :  { %313 = vrcp.f32 %v187_v51  ;;  %v199_v10 = vand.u32 2147483648, %v187_v51  ;;  %v197_v13 = vand.u32 2147483647, %v187_v51  ;;  %vm193_vm11 = vweird.f32 %v187_v51 }
 0x13b   :  { %v312_v52 = vpop.eup %311  ;;  %v177_v18 = vmul.f32 %v176_v9, %v456_v8 }
 0x13c   :  { %v149_v55 = vmul.f32 %v312_v52, %v147_v45  ;;  %vm154_vm6 = vweird.f32 %v312_v52  ;;  %v200_v17 = vor.u32 1.1754944e-38, %v199_v10  ;;  %vm198_vm13 = vcmp.eq.f32.partialorder %v197_v13, 8.507059e+37 }
 0x13d   :  { %vm155_vm8 = vmor %vm153_vm7, %vm154_vm6 }
 0x13e   :  { %v150_v56 = vsub.f32 1.0, %v149_v55 }
 0x140   :  { %v314_v59 = vpop.eup %313  ;;  %v151_v61 = vmul.f32 %v312_v52, %v150_v56 }
 0x141   :  { %v189_v0 = vmul.f32 %v314_v59, %v187_v51  ;;  %vm194_vm10 = vweird.f32 %v314_v59 }
 0x142   :  { %v152_v2 = vadd.f32 %v312_v52, %v151_v61  ;;  %vm195_vm12 = vmor %vm193_vm11, %vm194_vm10 }
 0x143   :  { %v190_v6 = vsub.f32 1.0, %v189_v0 }
 0x144   :  { %v156_v7 = vsel %vm155_vm8, %v312_v52, %v152_v2 }
 0x145   :  { %v161_v11 = vsel %vm158_vm9, %v160_v4, %v156_v7  ;;  %v191_v12 = vmul.f32 %v314_v59, %v190_v6 }
 0x146   :  { %v162_v14 = vmul.f32 %v161_v11, %v137_v3 }
 0x147   :  { %v192_v15 = vadd.f32 %v314_v59, %v191_v12 }
 0x148   :  { %v271_v16 = vclamps-f32 %v162_v14, 1.0 }
 0x149   :  { %v196_v1 = vsel %vm195_vm12, %v314_v59, %v192_v15 }
 0x14a   :  { %v205_v20 = vadd.f32 1.0, %v271_v16  ;;  %v201_v21 = vsel %vm198_vm13, %v200_v17, %v196_v1 }
 0x14b   :  { %v202_v22 = vmul.f32 %v201_v21, %v177_v18 }
 0x14c   :  { %v207_v23 = vmul.f32 %v205_v20, %v121_v19 }
 0x14d   :  { %v272_v24 = vclamps-f32 %v202_v22, 1.0 }
 0x14e   :  { %243 = vmatmul.f32.vlgmr.msra.gmra.mxu1 %v207_v23 }
 0x14f   :  { %v206_v26 = vadd.f32 1.0, %v272_v24 }
 0x151   :  { %v208_v27 = vmul.f32 %v206_v26, %v122_v25 }
 0x153   :  { %246 = vmatmul.f32.vlgmr.msra.gmra.mxu3 %v208_v27 }
 0x1cb   :  { %v244_v8 = vpop.f32.mrf.mxu1 }
 0x1cc   :  { %v263_v29 = vadd.f32 %v306_v28, %v244_v8 }
 0x1ce   :  { %265 = vst [vmem:[%s506_s5] sm:$0xff] %v263_v29 }
 0x1d6   :  { %v247_v62 = vpop.f32.mrf.mxu3 }
 0x1d7   :  { %v264_v30 = vadd.f32 %v306_v28, %v247_v62 }
 0x1d9   :  { %266 = vst [vmem:[%s506_s5 + $0x8] sm:$0xff] %v264_v30 }

</bundles_post_ra>
